<compile_context>
chip_gen: v7x
topology: tpu7x:2x2x1
jax: 0.10.0
libtpu: 0.0.40
codegen_flags: <defaults>
</compile_context>

<pallas_src>
import jax
import jax.numpy as jnp
from jax.experimental import pallas as pl
from jax.experimental.pallas import tpu as pltpu


def _sine_encoding_kernel(tau_ref, w_ref, b_ref, mask_ref, o_ref):
    # One MXU matmul per row tile; weights/bias/mask are VMEM-resident.
    z = jnp.dot(tau_ref[...], w_ref[...], preferred_element_type=jnp.float32)
    z = z + b_ref[...]                       # [1, pout] broadcasts over rows
    # mask == 1.0 for sin columns, 0.0 for the per-row final linear column.
    o_ref[...] = jnp.where(mask_ref[...] > 0.0, jnp.sin(z), z).astype(o_ref.dtype)


def _round_up(x: int, m: int) -> int:
    return ((x + m - 1) // m) * m


def _choose_pack(in_f: int, out_f: int, max_pack: int = 16) -> int:
    """Smallest row-packing factor that makes BOTH packed widths multiples of
    128 lanes (unmasked vld + vst); else lane-dense output only; else 1."""
    for p in range(1, max_pack + 1):
        if (p * in_f) % 128 == 0 and (p * out_f) % 128 == 0:
            return p
    for p in range(1, max_pack + 1):
        if (p * out_f) % 128 == 0:
            return p
    return 1


def _choose_tile_rows(n_rows: int, row_bytes: int,
                      max_tile: int = 1024,
                      vmem_budget_bytes: int = 12 * 1024 * 1024) -> int:
    """Largest packed-row tile (multiple of 8) whose double-buffered in+out
    tiles fit a conservative VMEM budget (safe on v5e/v6e/v7x defaults)."""
    cap = max(8, vmem_budget_bytes // (2 * row_bytes))     # x2 double buffering
    tile = max(8, (min(max_tile, cap) // 8) * 8)
    if n_rows <= tile:                                      # single-block case
        tile = _round_up(max(n_rows, 1), 8)
    return tile


def sine_encoding(tau, w, b, w0, b0, *, max_tile_rows: int = 1024):
    """Pallas implementation of SineEncoding.forward.

    tau: [N, in_features]
    w:   [in_features, out_features - 1]
    b:   [out_features - 1]
    w0:  [in_features, 1]
    b0:  [1]
    returns: [N, out_features]
    """
    n, in_f = tau.shape
    out_f = w.shape[1] + 1

    # Glue: pack (w, w0) / (b, b0) so the hot path is a single matmul.
    w_full = jnp.concatenate([w, w0], axis=1).astype(jnp.float32)     # [in, out]
    b_full = jnp.concatenate([b, b0], axis=0).astype(jnp.float32)     # [out]
    mask_row = (jnp.arange(out_f) < out_f - 1).astype(jnp.float32)    # [out]

    pack = _choose_pack(in_f, out_f)
    pin, pout = pack * in_f, pack * out_f

    if pack > 1:
        # Block-diagonal weight: z[g, q*out+o] = sum_i tau[g*pack+q, i] * W[i, o]
        eye = jnp.eye(pack, dtype=jnp.float32)
        w_k = jnp.einsum('pq,io->piqo', eye, w_full).reshape(pin, pout)
        b_k = jnp.tile(b_full, pack).reshape(1, pout)
        m_k = jnp.tile(mask_row, pack).reshape(1, pout)
    else:
        w_k = w_full
        b_k = b_full.reshape(1, out_f)
        m_k = mask_row.reshape(1, out_f)

    # Pad logical rows to a whole number of packed-row tiles.
    n_packed = pl.cdiv(n, pack)
    row_bytes = (pin + pout) * 4                         # f32 in-tile + out-tile
    tile = _choose_tile_rows(n_packed, row_bytes, max_tile=max_tile_rows)
    n_packed_pad = _round_up(n_packed, tile)
    n_pad = n_packed_pad * pack

    tau_p = tau.astype(jnp.float32)
    if n_pad != n:
        tau_p = jnp.pad(tau_p, ((0, n_pad - n), (0, 0)))
    tau_packed = tau_p.reshape(n_packed_pad, pin)        # free contiguous reshape

    out_packed = pl.pallas_call(
        _sine_encoding_kernel,
        out_shape=jax.ShapeDtypeStruct((n_packed_pad, pout), tau.dtype),
        grid=(n_packed_pad // tile,),
        in_specs=[
            pl.BlockSpec((tile, pin), lambda i: (i, 0)),          # packed tau rows
            pl.BlockSpec((pin, pout), lambda i: (0, 0)),          # W (VMEM-resident)
            pl.BlockSpec((1, pout), lambda i: (0, 0)),            # bias (resident)
            pl.BlockSpec((1, pout), lambda i: (0, 0)),            # mask (resident)
        ],
        out_specs=pl.BlockSpec((tile, pout), lambda i: (i, 0)),
        compiler_params=pltpu.CompilerParams(
            dimension_semantics=("parallel",),                    # 2 TCs on v7x
        ),
    )(tau_packed, w_k, b_k, m_k)

    out = out_packed.reshape(n_pad, out_f)               # free contiguous reshape
    return out if n_pad == n else out[:n]


def sine_encoding_ref(tau, w, b, w0, b0):
    """Pure-JAX reference mirroring the PyTorch forward exactly."""
    v1 = jnp.sin(jnp.matmul(tau, w) + b)
    v2 = jnp.matmul(tau, w0) + b0
    return jnp.concatenate([v1, v2], axis=1)


if __name__ == "__main__":
    in_features = 16
    out_features = 32

    key = jax.random.PRNGKey(0)
    k_tau, k_w0, k_b0, k_w, k_b, k_tau2 = jax.random.split(key, 6)

    # Deterministic synthetic parameters (same shapes as the nn.Module __init__).
    w0 = jax.random.normal(k_w0, (in_features, 1), dtype=jnp.float32)
    b0 = jax.random.normal(k_b0, (1,), dtype=jnp.float32)
    w = jax.random.normal(k_w, (in_features, out_features - 1), dtype=jnp.float32)
    b = jax.random.normal(k_b, (out_features - 1,), dtype=jnp.float32)

    # 1) Small case (module-sized test): single packed block.
    batch = 8
    tau = jax.random.normal(k_tau, (batch, in_features), dtype=jnp.float32)
    out = jax.block_until_ready(sine_encoding(tau, w, b, w0, b0))
    ref = sine_encoding_ref(tau, w, b, w0, b0)
    assert out.shape == (batch, out_features), out.shape
    assert jnp.allclose(out, ref, atol=1e-5, rtol=1e-5), "mismatch vs reference (small)"

    # 2) Ragged, multi-row case: exercises packing + tail-padding path.
    batch2 = 1300  # not a multiple of pack (8) nor of the row tile
    tau2 = jax.random.normal(k_tau2, (batch2, in_features), dtype=jnp.float32)
    out2 = jax.block_until_ready(sine_encoding(tau2, w, b, w0, b0))
    ref2 = sine_encoding_ref(tau2, w, b, w0, b0)
    assert out2.shape == (batch2, out_features), out2.shape
    assert jnp.allclose(out2, ref2, atol=1e-5, rtol=1e-5), "mismatch vs reference (tiled)"

    print("KERNEL_OK")
</pallas_src>

<mosaic_0001>
module attributes {stable_mosaic.version = 11 : i64} {
  func.func @_sine_encoding_kernel(%arg0: i32, %arg1: memref<8x128xf32, #tpu.memory_space<vmem>>, %arg2: memref<128x256xf32, #tpu.memory_space<vmem>>, %arg3: memref<1x256xf32, #tpu.memory_space<vmem>>, %arg4: memref<1x256xf32, #tpu.memory_space<vmem>>, %arg5: memref<8x256xf32, #tpu.memory_space<vmem>>) attributes {dimension_semantics = [#tpu.dimension_semantics<parallel>], iteration_bounds = array<i64: 1>, scalar_prefetch = 0 : i64, scratch_operands = 0 : i64, tpu.core_type = #tpu.core_type<tc>, window_params = [{transform_indices = @transform_0, window_bounds = array<i64: 8, 128>}, {pipeline_mode = #tpu.pipeline_mode<synchronous>, transform_indices = @transform_1, window_bounds = array<i64: 128, 256>}, {pipeline_mode = #tpu.pipeline_mode<synchronous>, transform_indices = @transform_2, window_bounds = array<i64: 1, 256>}, {pipeline_mode = #tpu.pipeline_mode<synchronous>, transform_indices = @transform_3, window_bounds = array<i64: 1, 256>}, {transform_indices = @transform_4, window_bounds = array<i64: 8, 256>}]} {
    %c0 = arith.constant 0 : index
    %c0_0 = arith.constant 0 : index
    %0 = vector.load %arg1[%c0, %c0_0] : memref<8x128xf32, #tpu.memory_space<vmem>>, vector<8x128xf32>
    %c0_1 = arith.constant 0 : index
    %c0_2 = arith.constant 0 : index
    %1 = vector.load %arg2[%c0_1, %c0_2] : memref<128x256xf32, #tpu.memory_space<vmem>>, vector<128x256xf32>
    %cst = arith.constant dense<0.000000e+00> : vector<8x256xf32>
    %2 = tpu.matmul %0, %1, %cst {dimension_numbers = #tpu.dot_dimension_numbers<[1], [0], [0], [1], [0, 0, 1, 1], [], []>} : vector<8x128xf32>, vector<128x256xf32>, vector<8x256xf32> -> vector<8x256xf32>
    %c0_3 = arith.constant 0 : index
    %c0_4 = arith.constant 0 : index
    %3 = vector.load %arg3[%c0_3, %c0_4] : memref<1x256xf32, #tpu.memory_space<vmem>>, vector<1x256xf32>
    %4 = vector.broadcast %3 : vector<1x256xf32> to vector<8x256xf32>
    %5 = arith.addf %2, %4 : vector<8x256xf32>
    %c0_5 = arith.constant 0 : index
    %c0_6 = arith.constant 0 : index
    %6 = vector.load %arg4[%c0_5, %c0_6] : memref<1x256xf32, #tpu.memory_space<vmem>>, vector<1x256xf32>
    %cst_7 = arith.constant 0.000000e+00 : f32
    %7 = vector.broadcast %cst_7 : f32 to vector<1x256xf32>
    %8 = arith.cmpf ogt, %6, %7 : vector<1x256xf32>
    %9 = math.sin %5 : vector<8x256xf32>
    %10 = vector.shape_cast %8 : vector<1x256xi1> to vector<1x256xi1>
    %11 = vector.broadcast %10 : vector<1x256xi1> to vector<8x256xi1>
    %12 = arith.select %11, %9, %5 : vector<8x256xi1>, vector<8x256xf32>
    %c0_8 = arith.constant 0 : index
    %c0_9 = arith.constant 0 : index
    %13 = vector.load %arg5[%c0_8, %c0_9] : memref<8x256xf32, #tpu.memory_space<vmem>>, vector<8x256xf32>
    tpu.vector_store %arg5[%c0_8, %c0_9], %12 {strides = array<i32>} : memref<8x256xf32, #tpu.memory_space<vmem>>, vector<8x256xf32>,
    return
  }
  func.func @transform_0(%arg0: i32) -> (i32, i32) {
    %c0_i32 = arith.constant 0 : i32
    %c0_i32_0 = arith.constant 0 : i32
    return %arg0, %c0_i32 : i32, i32
  }
  func.func @transform_1(%arg0: i32) -> (i32, i32) {
    %c0_i32 = arith.constant 0 : i32
    %c0_i32_0 = arith.constant 0 : i32
    %c0_i32_1 = arith.constant 0 : i32
    return %c0_i32, %c0_i32_0 : i32, i32
  }
  func.func @transform_2(%arg0: i32) -> (i32, i32) {
    %c0_i32 = arith.constant 0 : i32
    %c0_i32_0 = arith.constant 0 : i32
    %c0_i32_1 = arith.constant 0 : i32
    return %c0_i32, %c0_i32_0 : i32, i32
  }
  func.func @transform_3(%arg0: i32) -> (i32, i32) {
    %c0_i32 = arith.constant 0 : i32
    %c0_i32_0 = arith.constant 0 : i32
    %c0_i32_1 = arith.constant 0 : i32
    return %c0_i32, %c0_i32_0 : i32, i32
  }
  func.func @transform_4(%arg0: i32) -> (i32, i32) {
    %c0_i32 = arith.constant 0 : i32
    %c0_i32_0 = arith.constant 0 : i32
    return %arg0, %c0_i32 : i32, i32
  }
}

</mosaic_0001>

<bundles_post_ra>
// kernel: tpu_custom_call.1
= control target key start
LH: loop header
LB: loop body
LE: loop exit
PB: predicated region body
PF: predicated region fallthrough
CT: control target
= control target key end

     0   :  { %9 = vsyncpa [#allocation3], 0  ;;  %s722_s0 = inlined_call_operand.hbm [shape: f32[8,128], index: 0, kind: input, shape index: {}]   ;;  %s723_s1 = inlined_call_operand.hbm [shape: f32[128,256], index: 1, kind: input, shape index: {}]   ;;  %s724_s2 = inlined_call_operand.vmem [shape: f32[1,256], index: 2, kind: input, shape index: {}]   ;;  %s725_s3 = inlined_call_operand.vmem [shape: f32[1,256], index: 3, kind: input, shape index: {}]   ;;  %s726_s4 = inlined_call_operand.hbm [shape: f32[8,256], index: 4, kind: output, shape index: {}]  }
   0x1   :  { %10 = vsyncpa [#allocation6], 0 }
   0x2   :  { %11 = vsyncpa [#allocation4], 0  ;;  %s542_s15 = smov [#allocation2]   ;;  %s543_s17 = smov [#allocation5]  }
   0x3   :  { %s18_s16 = sshll.u32 %s542_s15, 4  ;;  %s27_s18 = sshll.u32 %s543_s17, 4  ;;  %s19_s16 = int_to_ptr.vmem [resolvable:$true] %s18_s16  ;;  %s580_s18 = int_to_ptr.vmem [resolvable:$true] %s27_s18 }
   0x4   :  { %s470_s21 = scalar_lea.hbm %s722_s0, 128 }
   0x5   :  { %p471_p0 = scmp.ne.s32.totalorder %s722_s0, %s470_s21  ;;  %p474_p1 = scmp.lt.u32.totalorder %s470_s21, %s722_s0 }
   0x7   :  { %p476_p2 = pnand %p474_p1, %p471_p0 }
   0x9   :  { %479 = shalt.err (!%p476_p2)
}
   0xa   :  { %s480_s26 = scalar_lea.vmem %s19_s16, 128  ;;  %p485_p4 = scmp.lt.s32.totalorder %s19_s16, %s19_s16 }
   0xb   :  { %p481_p3 = scmp.ne.s32.totalorder %s19_s16, %s480_s26  ;;  %p486_p5 = scmp.lt.s32.totalorder %s480_s26, %s480_s26 }
   0xd   :  { %p487_p6 = por %p486_p5, %p485_p4 }
   0xf   :  { %p488_p7 = pnand %p487_p6, %p481_p3 }
  0x11   :  { %491 = shalt.err (!%p488_p7)
}
  0x12   :  { %21 = dma.hbm_to_vmem [thread:$0]  %s722_s0, 128, %s19_s16, [#allocation3]  }
  0x13   :  { %s492_s5 = scalar_lea.hbm %s723_s1, 4096 }
  0x14   :  { %p493_p8 = scmp.ne.s32.totalorder %s723_s1, %s492_s5  ;;  %p496_p9 = scmp.lt.u32.totalorder %s492_s5, %s723_s1 }
  0x16   :  { %p498_p10 = pnand %p496_p9, %p493_p8 }
  0x18   :  { %501 = shalt.err (!%p498_p10)
}
  0x19   :  { %s502_s10 = scalar_lea.vmem %s580_s18, 4096  ;;  %p507_p12 = scmp.lt.s32.totalorder %s580_s18, %s580_s18 }
  0x1a   :  { %p503_p11 = scmp.ne.s32.totalorder %s580_s18, %s502_s10  ;;  %p508_p13 = scmp.lt.s32.totalorder %s502_s10, %s502_s10 }
  0x1c   :  { %p509_p0 = por %p508_p13, %p507_p12 }
  0x1e   :  { %p510_p1 = pnand %p509_p0, %p503_p11 }
  0x20   :  { %513 = shalt.err (!%p510_p1)
}
  0x21   :  { %s544_s0 = smov 256   ;;  %s545_s11 = smov 16  }
  0x22   :  { %33 = dma.hbm_to_vmem [thread:$0]  %s723_s1, 4096, %s580_s18, [#allocation6], %s544_s0, %s544_s0, %s545_s11  }
  0x23   :  { %536 = dma.done.wait [#allocation3], 128  }
  0x24   :  { %537 = vsyncadd [#allocation3], 4294967168 }
  0x25   :  { %538 = dma.done.wait [#allocation6], 4096  }
  0x26   :  { %539 = vsyncadd [#allocation6], 4294963200  ;;  %v546_v0 = vmov 0.0   ;;  %v46_v1 = vld [vmem:[#allocation5 + $0x8] sm:$0xff]  ;;  %v48_v2 = vld [vmem:[#allocation5 + $0x18] sm:$0xff]  ;;  %v79_v50 = vlaneseq }
  0x27   :  { %153 = vmatprep.mubr.f32.mxu0 %v546_v0  ;;  %v45_v3 = vld [vmem:[#allocation5] sm:$0xff]  ;;  %v409_v4 = vpack.c.bf16 %v48_v2, %v46_v1  ;;  %v47_v5 = vld [vmem:[#allocation5 + $0x10] sm:$0xff]  ;;  %v50_v6 = vld [vmem:[#allocation5 + $0x28] sm:$0xff] }
  0x28   :  { %v52_v7 = vld [vmem:[#allocation5 + $0x38] sm:$0xff]  ;;  %v411_v8 = vpack.c.bf16 %v47_v5, %v45_v3  ;;  %v49_v10 = vld [vmem:[#allocation5 + $0x20] sm:$0xff]  ;;  %v51_v11 = vld [vmem:[#allocation5 + $0x30] sm:$0xff]  ;;  %v611_v51 = vshrl.u32 %v79_v50, 7 }
  0x29   :  { %v413_v9 = vpack.c.bf16 %v52_v7, %v50_v6  ;;  %v54_v12 = vld [vmem:[#allocation5 + $0x48] sm:$0xff]  ;;  %410 = vmatprep.subr.bf16.mxu0 %v409_v4  ;;  %v56_v13 = vld [vmem:[#allocation5 + $0x58] sm:$0xff]  ;;  %v415_v14 = vpack.c.bf16 %v51_v11, %v49_v10  ;;  %v53_v16 = vld [vmem:[#allocation5 + $0x40] sm:$0xff] }
  0x2a   :  { %412 = vmatpush1.bf16.msra.mxu0 %v411_v8  ;;  %v417_v15 = vpack.c.bf16 %v56_v13, %v54_v12  ;;  %v55_v17 = vld [vmem:[#allocation5 + $0x50] sm:$0xff]  ;;  %v58_v18 = vld [vmem:[#allocation5 + $0x68] sm:$0xff]  ;;  %v60_v19 = vld [vmem:[#allocation5 + $0x78] sm:$0xff]  ;;  %v81_v52 = vsub.s32 0, %v611_v51  ;;  %v85_v54 = vsub.s32 1, %v611_v51 }
  0x2b   :  { %414 = vmatprep.subr.bf16.mxu0 %v413_v9  ;;  %v419_v20 = vpack.c.bf16 %v55_v17, %v53_v16  ;;  %v421_v21 = vpack.c.bf16 %v60_v19, %v58_v18  ;;  %v57_v22 = vld [vmem:[#allocation5 + $0x60] sm:$0xff]  ;;  %v59_v23 = vld [vmem:[#allocation5 + $0x70] sm:$0xff]  ;;  %v62_v24 = vld [vmem:[#allocation5 + $0x88] sm:$0xff]  ;;  %v547_v19 = vmov 2102212464  }
  0x2c   :  { %v64_v25 = vld [vmem:[#allocation5 + $0x98] sm:$0xff]  ;;  %v423_v26 = vpack.c.bf16 %v59_v23, %v57_v22  ;;  %v61_v28 = vld [vmem:[#allocation5 + $0x80] sm:$0xff]  ;;  %v63_v29 = vld [vmem:[#allocation5 + $0x90] sm:$0xff] }
  0x2d   :  { %v425_v27 = vpack.c.bf16 %v64_v25, %v62_v24  ;;  %v66_v30 = vld [vmem:[#allocation5 + $0xa8] sm:$0xff]  ;;  %v68_v31 = vld [vmem:[#allocation5 + $0xb8] sm:$0xff]  ;;  %v427_v32 = vpack.c.bf16 %v63_v29, %v61_v28  ;;  %v65_v34 = vld [vmem:[#allocation5 + $0xa0] sm:$0xff]  ;;  %v549_v25 = vmov 1326507024  }
  0x2e   :  { %416 = vmatpush1.bf16.msra.mxu0 %v415_v14  ;;  %v429_v33 = vpack.c.bf16 %v68_v31, %v66_v30  ;;  %v67_v35 = vld [vmem:[#allocation5 + $0xb0] sm:$0xff]  ;;  %v70_v36 = vld [vmem:[#allocation5 + $0xc8] sm:$0xff]  ;;  %v72_v37 = vld [vmem:[#allocation5 + $0xd8] sm:$0xff]  ;;  %v550_v31 = vmov 683565275  }
  0x2f   :  { %418 = vmatprep.subr.bf16.mxu0 %v417_v15  ;;  %v431_v38 = vpack.c.bf16 %v67_v35, %v65_v34  ;;  %v433_v39 = vpack.c.bf16 %v72_v37, %v70_v36  ;;  %v69_v40 = vld [vmem:[#allocation5 + $0xc0] sm:$0xff]  ;;  %v71_v41 = vld [vmem:[#allocation5 + $0xd0] sm:$0xff]  ;;  %v74_v42 = vld [vmem:[#allocation5 + $0xe8] sm:$0xff] }
  0x30   :  { %v76_v43 = vld [vmem:[#allocation5 + $0xf8] sm:$0xff]  ;;  %v435_v44 = vpack.c.bf16 %v71_v41, %v69_v40  ;;  %v73_v46 = vld [vmem:[#allocation5 + $0xe0] sm:$0xff]  ;;  %v75_v47 = vld [vmem:[#allocation5 + $0xf0] sm:$0xff] }
  0x31   :  { %v437_v45 = vpack.c.bf16 %v76_v43, %v74_v42  ;;  %v439_v48 = vpack.c.bf16 %v75_v47, %v73_v46  ;;  %v44_v49 = vld [vmem:[#allocation2] sm:$0xff] }
  0x32   :  { %420 = vmatpush1.bf16.msra.mxu0 %v419_v20  ;;  %v77_v53 = vld [vmem:[%s724_s2] sm:$0x3] }
  0x33   :  { %422 = vmatprep.subr.bf16.mxu0 %v421_v21  ;;  %v82_v55 = vrot.slane %v77_v53, %v81_v52  ;;  %v86_v56 = vrot.slane %v77_v53, %v85_v54  ;;  %v548_v21 = vmov 920167782  }
  0x36   :  { %424 = vmatpush1.bf16.msra.mxu0 %v423_v26 }
  0x37   :  { %426 = vmatprep.subr.bf16.mxu0 %v425_v27 }
  0x3a   :  { %428 = vmatpush1.bf16.msra.mxu0 %v427_v32 }
  0x3b   :  { %430 = vmatprep.subr.bf16.mxu0 %v429_v33  ;;  %v551_v33 = vmov 2475754826  }
  0x3e   :  { %432 = vmatpush1.bf16.msra.mxu0 %v431_v38  ;;  %v552_v38 = vmov 2131351028  }
  0x3f   :  { %434 = vmatprep.subr.bf16.mxu0 %v433_v39 }
  0x42   :  { %436 = vmatpush1.bf16.msra.mxu0 %v435_v44 }
  0x43   :  { %438 = vmatprep.subr.bf16.mxu0 %v437_v45 }
  0x46   :  { %440 = vmatpush1.bf16.msra.mxu0 %v439_v48 }
  0x49   :  { %154 = vmatmul.mubr.f32.vlgmr.msra.gmra.mrb[0].mxu0 %v44_v49 }
 0x11c   :  { %v155_v57 = vpop.f32.mrb[0].mxu0 }
 0x11d   :  { %v622_v58 = vadd.f32 %v155_v57, %v82_v55  ;;  %v157_v59 = vpop.f32.mrb[1].mxu0 }
 0x11e   :  { %v624_v60 = vadd.f32 %v157_v59, %v86_v56 }
 0x11f   :  { %v165_v61 = vand.u32 2139095040, %v622_v58  ;;  %v162_v62 = vand.u32 2147483647, %v622_v58  ;;  %vm164_vm14 = vcmp.lt.s32.totalorder %v622_v58, 0 }
 0x120   :  { %v269_v63 = vand.u32 2139095040, %v624_v60  ;;  %v266_v4 = vand.u32 2147483647, %v624_v60 }
 0x121   :  { %v166_v0 = vshrl.u32 %v165_v61, 23  ;;  %v169_v3 = vand.u32 8388607, %v162_v62  ;;  %vm163_vm15 = vcmp.le.f32.partialorder %v162_v62, 0.7853982  ;;  %v553_v62 = vmov 0  }
 0x122   :  { %v270_v1 = vshrl.u32 %v269_v63, 23  ;;  %v634_v9 = vand.u32 8388607, %v266_v4 }
 0x123   :  { %v401_v2 = vadd.s32 4294967169, %v166_v0  ;;  %v170_v8 = vor.u32 8388608, %v169_v3 }
 0x124   :  { %v405_v5 = vadd.s32 4294967169, %v270_v1  ;;  %v274_v18 = vor.u32 8388608, %v634_v9 }
 0x125   :  { %v172_v6 = vadd.s32 1, %v401_v2  ;;  %v638_v17 = vshll.u32 %v170_v8, 8 }
 0x126   :  { %v276_v7 = vadd.s32 1, %v405_v5 }
 0x127   :  { %vm173_vm0 = vcmp.gt.s32.totalorder %v172_v6, 0 }
 0x128   :  { %v174_v10 = vsel %vm173_vm0, %v172_v6, 0  ;;  %vm277_vm1 = vcmp.gt.s32.totalorder %v276_v7, 0 }
 0x129   :  { %v175_v11 = vshrl.u32 %v174_v10, 5  ;;  %v176_v12 = vand.u32 31, %v174_v10  ;;  %v278_v13 = vsel %vm277_vm1, %v276_v7, 0  ;;  %vm268_vm1 = vcmp.lt.s32.totalorder %v624_v60, 0 }
 0x12a   :  { %v280_v14 = vand.u32 31, %v278_v13  ;;  %v636_v16 = vshrl.u32 %v278_v13, 5 }
 0x12b   :  { %v177_v15 = vsub.s32 32, %v176_v12  ;;  %v188_v20 = vshll.u32 %v547_v19, %v176_v12  ;;  %v191_v22 = vshll.u32 %v548_v21, %v176_v12  ;;  %vm197_vm2 = vcmp.lt.s32.totalorder %v175_v11, 4 }
 0x12c   :  { %v281_v23 = vsub.s32 32, %v280_v14  ;;  %v292_v27 = vshll.u32 %v547_v19, %v280_v14  ;;  %v295_v28 = vshll.u32 %v548_v21, %v280_v14  ;;  %v179_v32 = vshll.u32 %v550_v31, %v176_v12 }
 0x12d   :  { %v189_v24 = vshrl.u32 %v548_v21, %v177_v15  ;;  %v192_v26 = vshrl.u32 %v549_v25, %v177_v15  ;;  %v180_v34 = vshrl.u32 %v551_v33, %v177_v15  ;;  %v182_v37 = vshll.u32 %v551_v33, %v176_v12 }
 0x12e   :  { %v293_v29 = vshrl.u32 %v548_v21, %v281_v23  ;;  %v296_v30 = vshrl.u32 %v549_v25, %v281_v23  ;;  %v183_v39 = vshrl.u32 %v552_v38, %v177_v15  ;;  %vm301_vm3 = vcmp.lt.s32.totalorder %v636_v16, 4 }
 0x12f   :  { %v190_v35 = vor.u32 %v189_v24, %v188_v20  ;;  %v193_v36 = vor.u32 %v192_v26, %v191_v22  ;;  %v181_v40 = vor.u32 %v180_v34, %v179_v32  ;;  %v185_v41 = vshll.u32 %v552_v38, %v176_v12 }
 0x130   :  { %v186_v42 = vshrl.u32 %v547_v19, %v177_v15  ;;  %v178_v45 = vshrl.u32 %v550_v31, %v177_v15  ;;  %v184_v46 = vor.u32 %v183_v39, %v182_v37  ;;  %v294_v47 = vor.u32 %v293_v29, %v292_v27 }
 0x131   :  { %v203_v43 = vsel %vm197_vm2, %v190_v35, 920167782  ;;  %v207_v44 = vsel %vm197_vm2, %v193_v36, 1326507024  ;;  %v297_v48 = vor.u32 %v296_v30, %v295_v28  ;;  %vm194_vm4 = vcmp.lt.s32.totalorder %v175_v11, 1 }
 0x132   :  { %v187_v49 = vor.u32 %v186_v42, %v185_v41  ;;  %vm195_vm5 = vcmp.lt.s32.totalorder %v175_v11, 2  ;;  %vm196_vm6 = vcmp.lt.s32.totalorder %v175_v11, 3  ;;  %v198_v50 = vsel %vm194_vm4, %v178_v45, %v181_v40 }
 0x133   :  { %v202_v53 = vsel %vm194_vm4, %v181_v40, %v184_v46  ;;  %v208_v59 = vsel %vm196_vm6, %v190_v35, %v207_v44  ;;  %v283_v1 = vshll.u32 %v550_v31, %v280_v14  ;;  %v284_v6 = vshrl.u32 %v551_v33, %v281_v23 }
 0x134   :  { %v199_v55 = vsel %vm197_vm2, %v187_v49, 2102212464  ;;  %v204_v56 = vsel %vm196_vm6, %v187_v49, %v203_v43  ;;  %v206_v57 = vsel %vm194_vm4, %v184_v46, %v187_v49  ;;  %v311_v7 = vsel %vm301_vm3, %v297_v48, 1326507024 }
 0x135   :  { %v200_v61 = vsel %vm196_vm6, %v184_v46, %v199_v55  ;;  %v205_v63 = vsel %vm195_vm5, %v202_v53, %v204_v56  ;;  %v209_v0 = vsel %vm195_vm5, %v206_v57, %v208_v59  ;;  %v286_v10 = vshll.u32 %v551_v33, %v280_v14 }
 0x136   :  { %v201_v2 = vsel %vm195_vm5, %v198_v50, %v200_v61  ;;  %v646_v3 = vmul.u32.u64.low %v638_v17, %v209_v0  ;;  %v647_v5 = vmul.u32.u64.high %v638_v17, %v209_v0, %v646_v3  ;;  %v285_v11 = vor.u32 %v284_v6, %v283_v1 }
 0x137   :  { %v652_v8 = vmul.u32.u64.low %v638_v17, %v205_v63  ;;  %v653_v9 = vmul.u32.u64.high %v638_v17, %v205_v63, %v652_v8  ;;  %v287_v12 = vshrl.u32 %v552_v38, %v281_v23  ;;  %v289_v13 = vshll.u32 %v552_v38, %v280_v14 }
 0x138   :  { %v290_v15 = vshrl.u32 %v547_v19, %v281_v23  ;;  %v307_v20 = vsel %vm301_vm3, %v294_v47, 920167782  ;;  %v217_v21 = vmul.u32 %v638_v17, %v201_v2  ;;  %v282_v22 = vshrl.u32 %v550_v31, %v281_v23 }
 0x139   :  { %v314_v24 = vshll.u32 %v274_v18, 8  ;;  %vm219_vm7 = vc.u32 %v647_v5, %v652_v8  ;;  %v288_v25 = vor.u32 %v287_v12, %v286_v10  ;;  %vm300_vm8 = vcmp.lt.s32.totalorder %v636_v16, 3 }
 0x13a   :  { %v291_v26 = vor.u32 %v290_v15, %v289_v13  ;;  %v220_v27 = vadd.s32 1, %v653_v9  ;;  %vm298_vm9 = vcmp.lt.s32.totalorder %v636_v16, 1  ;;  %vm299_vm10 = vcmp.lt.s32.totalorder %v636_v16, 2 }
 0x13b   :  { %v312_v14 = vsel %vm300_vm8, %v294_v47, %v311_v7  ;;  %v306_v28 = vsel %vm298_vm9, %v285_v11, %v288_v25  ;;  %v302_v29 = vsel %vm298_vm9, %v282_v22, %v285_v11  ;;  %v218_v61 = vadd.s32 %v652_v8, %v647_v5 }
 0x13c   :  { %v303_v19 = vsel %vm301_vm3, %v291_v26, 2102212464  ;;  %v308_v17 = vsel %vm300_vm8, %v291_v26, %v307_v20  ;;  %v310_v23 = vsel %vm298_vm9, %v288_v25, %v291_v26  ;;  %v221_v18 = vsel %vm219_vm7, %v220_v27, %v653_v9 }
 0x13d   :  { %v309_v30 = vsel %vm299_vm10, %v306_v28, %v308_v17  ;;  %v313_v31 = vsel %vm299_vm10, %v310_v23, %v312_v14  ;;  %v222_v32 = vadd.s32 %v221_v18, %v217_v21  ;;  %v304_v33 = vsel %vm300_vm8, %v288_v25, %v303_v19 }
 0x13e   :  { %v670_v34 = vmul.u32.u64.low %v314_v24, %v313_v31  ;;  %v671_v35 = vmul.u32.u64.high %v314_v24, %v313_v31, %v670_v34  ;;  %v673_v36 = vmul.u32.u64.low %v314_v24, %v309_v30  ;;  %v674_v37 = vmul.u32.u64.high %v314_v24, %v309_v30, %v673_v36  ;;  %v160_v30 = vld [vmem:[%s725_s3] sm:$0x3]  ;;  %s554_s3 = smov [#allocation7]  }
 0x13f   :  { %v223_v38 = vadd.s32 536870912, %v222_v32  ;;  %v305_v39 = vsel %vm299_vm10, %v302_v29, %v304_v33  ;;  %vm161_vm0 = vcmp.gt.f32.partialorder %v160_v30, 0.0  ;;  %vm693_vm2 = vcmp.le.f32.partialorder %v266_v4, 0.7853982  ;;  %s391_s16 = sshll.u32 %s554_s3, 4  ;;  %s392_s16 = int_to_ptr.vmem [resolvable:$true] %s391_s16 }
 0x140   :  { %vm323_vm11 = vc.u32 %v671_v35, %v673_v36  ;;  %v324_v41 = vadd.s32 1, %v674_v37  ;;  %v321_v43 = vmul.u32 %v314_v24, %v305_v39  ;;  %v322_v21 = vadd.s32 %v673_v36, %v671_v35  ;;  %s514_s17 = scalar_lea.vmem %s392_s16, 256  ;;  %p519_p3 = scmp.lt.s32.totalorder %s392_s16, %s392_s16 }
 0x141   :  { %v224_v40 = vshrl.u32 %v223_v38, 30  ;;  %v370_v38 = vsel %vm161_vm0, 1, %v553_v62  ;;  %vm254_vm7 = vweird.f32 %v622_v58  ;;  %p515_p2 = scmp.ne.s32.totalorder %s392_s16, %s514_s17  ;;  %p520_p4 = scmp.lt.s32.totalorder %s514_s17, %s514_s17 }
 0x142   :  { %v325_v44 = vsel %vm323_vm11, %v324_v41, %v674_v37 }
 0x143   :  { %v225_v42 = vshll.u32 %v224_v40, 30  ;;  %v326_v46 = vadd.s32 %v325_v44, %v321_v43  ;;  %v248_v8 = vsub.s32 4, %v224_v40  ;;  %p521_p5 = por %p520_p4, %p519_p3 }
 0x145   :  { %v226_v45 = vsub.s32 %v222_v32, %v225_v42  ;;  %v327_v48 = vadd.s32 536870912, %v326_v46  ;;  %v249_v23 = vsel %vm164_vm14, %v248_v8, %v224_v40  ;;  %p522_p6 = pnand %p521_p5, %p515_p2 }
 0x146   :  { %v251_v31 = vsel %vm163_vm15, 0, %v249_v23 }
 0x147   :  { %v228_v47 = vsub.s32 0, %v226_v45  ;;  %v328_v50 = vshrl.u32 %v327_v48, 30  ;;  %v255_v36 = vadd.s32 3, %v251_v31 }
 0x149   :  { %v402_v49 = vmin.u32 %v228_v47, %v226_v45  ;;  %v329_v55 = vshll.u32 %v328_v50, 30  ;;  %v352_v35 = vsub.s32 4, %v328_v50  ;;  %v256_v42 = vand.u32 3, %v255_v36 }
 0x14b   :  { %v230_v53 = vclz %v402_v49  ;;  %v330_v16 = vsub.s32 %v326_v46, %v329_v55  ;;  %v353_v41 = vsel %vm268_vm1, %v352_v35, %v328_v50  ;;  %vm261_vm3 = vcmp.eq.s32.totalorder %v256_v42, 2 }
 0x14c   :  { %v355_v46 = vsel %vm693_vm2, 0, %v353_v41  ;;  %vm258_vm4 = vcmp.eq.s32.totalorder %v256_v42, 0  ;;  %vm257_vm5 = vcmp.lt.s32.totalorder %v256_v42, 2 }
 0x14d   :  { %v403_v56 = vadd.s32 4294967294, %v230_v53  ;;  %v332_v59 = vsub.s32 0, %v330_v16  ;;  %v359_v50 = vadd.s32 3, %v355_v46 }
 0x14f   :  { %vm404_vm12 = vcmp.lt.s32.totalorder %v403_v56, 0  ;;  %v406_v1 = vmin.u32 %v332_v59, %v330_v16  ;;  %v378_v59 = vrot.slane %v370_v38, %v85_v54 }
 0x150   :  { %v233_v57 = vsel %vm404_vm12, 0, %v403_v56  ;;  %vm358_vm12 = vweird.f32 %v624_v60 }
 0x151   :  { %v234_v63 = vsub.s32 32, %v233_v57  ;;  %v238_v0 = vsub.s32 4294967266, %v233_v57  ;;  %v235_v2 = vshll.u32 %v226_v45, %v233_v57  ;;  %v334_v7 = vclz %v406_v1 }
 0x152   :  { %v374_v45 = vrot.slane %v370_v38, %v81_v52  ;;  %vm380_vm11 = vcmp.eq.s32.totalorder %v378_v59, 1 }
 0x153   :  { %v236_v3 = vshrl.u32 %v218_v61, %v234_v63  ;;  %v239_v6 = vadd.s32 127, %v238_v0  ;;  %v407_v11 = vadd.s32 4294967294, %v334_v7 }
 0x154   :  { %vm379_vm6 = vcmp.eq.s32.totalorder %v374_v45, 1 }
 0x155   :  { %v237_v9 = vor.u32 %v236_v3, %v235_v2  ;;  %v240_v10 = vshll.u32 %v239_v6, 23  ;;  %vm408_vm13 = vcmp.lt.s32.totalorder %v407_v11, 0 }
 0x156   :  { %v337_v20 = vsel %vm408_vm13, 0, %v407_v11 }
 0x157   :  { %v241_v12 = vor.u32 4788187, %v240_v10  ;;  %v244_v15 = vcvt.s32.f32 %v237_v9  ;;  %v338_v22 = vsub.s32 32, %v337_v20  ;;  %v342_v24 = vsub.s32 4294967266, %v337_v20 }
 0x158   :  { %v339_v25 = vshll.u32 %v330_v16, %v337_v20  ;;  %v360_v16 = vand.u32 3, %v359_v50 }
 0x159   :  { %v242_v13 = vand.u32 2147483647, %v241_v12  ;;  %v340_v26 = vshrl.u32 %v322_v21, %v338_v22  ;;  %v343_v27 = vadd.s32 127, %v342_v24 }
 0x15a   :  { %vm365_vm8 = vcmp.eq.s32.totalorder %v360_v16, 2  ;;  %vm362_vm9 = vcmp.eq.s32.totalorder %v360_v16, 0  ;;  %vm361_vm10 = vcmp.lt.s32.totalorder %v360_v16, 2 }
 0x15b   :  { %v245_v5 = vmul.f32 %v244_v15, %v242_v13  ;;  %v341_v19 = vor.u32 %v340_v26, %v339_v25  ;;  %v344_v28 = vshll.u32 %v343_v27, 23 }
 0x15d   :  { %v246_v14 = vxor.u32 2147483648, %v245_v5  ;;  %v345_v29 = vor.u32 4788187, %v344_v28  ;;  %v348_v33 = vcvt.s32.f32 %v341_v19 }
 0x15f   :  { %v247_v17 = vsel %vm164_vm14, %v246_v14, %v245_v5  ;;  %v346_v32 = vand.u32 2147483647, %v345_v29 }
 0x160   :  { %v250_v18 = vsel %vm163_vm15, %v622_v58, %v247_v17 }
 0x161   :  { %462 = vcosq.f32 %v250_v18  ;;  %v349_v34 = vmul.f32 %v348_v33, %v346_v32 }
 0x162   :  { %464 = vsinq.f32 %v250_v18 }
 0x163   :  { %v350_v37 = vxor.u32 2147483648, %v349_v34 }
 0x165   :  { %v351_v40 = vsel %vm268_vm1, %v350_v37, %v349_v34 }
 0x166   :  { %v354_v43 = vsel %vm693_vm2, %v624_v60, %v351_v40 }
 0x167   :  { %466 = vcosq.f32 %v354_v43 }
 0x168   :  { %468 = vsinq.f32 %v354_v43 }
 0x16b   :  { %v463_v44 = vpop.eup %462 }
 0x16c   :  { %v465_v4 = vpop.eup %464  ;;  %v262_v47 = vxor.u32 2147483648, %v463_v44 }
 0x16d   :  { %v259_v48 = vxor.u32 2147483648, %v465_v4 }
 0x16e   :  { %v263_v49 = vsel %vm261_vm3, %v262_v47, %v465_v4 }
 0x16f   :  { %v260_v53 = vsel %vm258_vm4, %v463_v44, %v259_v48 }
 0x170   :  { %v264_v55 = vsel %vm257_vm5, %v260_v53, %v263_v49 }
 0x171   :  { %v265_v56 = vsel %vm254_vm7, nan, %v264_v55  ;;  %v467_v57 = vpop.eup %466 }
 0x172   :  { %v381_v52 = vsel %vm379_vm6, %v265_v56, %v622_v58  ;;  %v469_v61 = vpop.eup %468  ;;  %v366_v63 = vxor.u32 2147483648, %v467_v57 }
 0x173   :  { %383 = vst [vmem:[#allocation7] sm:$0xff] %v381_v52  ;;  %v363_v0 = vxor.u32 2147483648, %v469_v61 }
 0x174   :  { %v367_v1 = vsel %vm365_vm8, %v366_v63, %v469_v61 }
 0x175   :  { %v364_v2 = vsel %vm362_vm9, %v467_v57, %v363_v0 }
 0x176   :  { %v368_v3 = vsel %vm361_vm10, %v364_v2, %v367_v1 }
 0x177   :  { %v369_v58 = vsel %vm358_vm12, nan, %v368_v3 }
 0x178   :  { %v382_v6 = vsel %vm380_vm11, %v369_v58, %v624_v60 }
 0x179   :  { %384 = vst [vmem:[#allocation7 + $0x8] sm:$0xff] %v382_v6 }
 0x17a   :  { %525 = shalt.err (!%p522_p6)
}
 0x17b   :  { %s526_s20 = scalar_lea.hbm %s726_s4, 256 }
 0x17c   :  { %p527_p7 = scmp.ne.s32.totalorder %s726_s4, %s526_s20  ;;  %p530_p8 = scmp.lt.u32.totalorder %s526_s20, %s726_s4 }
 0x17e   :  { %p532_p9 = pnand %p530_p8, %p527_p7 }
 0x180   :  { %535 = shalt.err (!%p532_p9)
}
 0x181   :  { %394 = dma.vmem_to_hbm [thread:$0]  %s392_s16, 256, %s726_s4, [#allocation4]  }
 0x182   :  { %540 = dma.done.wait [#allocation4], 256  }
 0x183   :  { %541 = vsyncadd [#allocation4], 4294967040 }
 0x184   :  { %398 = vsyncpa [#allocation3], 1 }
 0x185   :  { %399 = vsyncpa [#allocation6], 1 }
 0x186   :  { %400 = vsyncpa [#allocation4], 1 }

</bundles_post_ra>
